<compile_context>
chip_gen: v7x
topology: tpu7x:2x2x1
jax: 0.10.0
libtpu: 0.0.40
codegen_flags: <defaults>
</compile_context>

<pallas_src>
import functools

import jax
import jax.numpy as jnp
from jax.experimental import pallas as pl
from jax.experimental.pallas import tpu as pltpu


def _round_up(x, n):
    return (x + n - 1) // n * n


def _cdiv(a, b):
    return (a + b - 1) // b


def _vmem_capacity_bytes():
    try:
        cap = int(getattr(pltpu.get_tpu_info(), "vmem_capacity_bytes", 0))
        if cap > 0:
            return cap
    except Exception:
        pass
    return 64 * 1024 * 1024  # conservative fallback (v7x-sized)


# --------------------------------------------------------------------------- #
# Kernels
# --------------------------------------------------------------------------- #
def _ffn_kernel_resident(x_ref, w1_ref, b1_ref, w2_ref, b2_ref, o_ref):
    # Full W1/W2 resident in VMEM (constant block index); one pass per row tile.
    h = jnp.dot(x_ref[...], w1_ref[...], preferred_element_type=jnp.float32)
    h = jnp.maximum(h + b1_ref[...].astype(jnp.float32), 0.0)
    # TODO(synk): dropout is identity in eval mode; training-mode dropout
    # (pltpu.prng_random_bits mask + 1/(1-p) scale) is not implemented here.
    out = jnp.dot(h.astype(w2_ref.dtype), w2_ref[...],
                  preferred_element_type=jnp.float32)
    o_ref[...] = (out + b2_ref[...].astype(jnp.float32)).astype(o_ref.dtype)


def _ffn_kernel_ktiled_f32out(x_ref, w1_ref, b1_ref, w2_ref, b2_ref, o_ref):
    # Hidden dim tiled on grid axis 1; f32 output block is resident across k,
    # so accumulate straight into it (no scratch, no zero-init pass).
    k = pl.program_id(1)
    h = jnp.dot(x_ref[...], w1_ref[...], preferred_element_type=jnp.float32)
    h = jnp.maximum(h + b1_ref[...].astype(jnp.float32), 0.0)
    part = jnp.dot(h.astype(w2_ref.dtype), w2_ref[...],
                   preferred_element_type=jnp.float32)

    @pl.when(k == 0)
    def _():
        o_ref[...] = part + b2_ref[...].astype(jnp.float32)

    @pl.when(k > 0)
    def _():
        o_ref[...] = o_ref[...] + part


def _ffn_kernel_ktiled_scratch(x_ref, w1_ref, b1_ref, w2_ref, b2_ref, o_ref,
                               acc_ref):
    # Hidden dim tiled; non-f32 output -> accumulate in an f32 VMEM scratch.
    k = pl.program_id(1)
    h = jnp.dot(x_ref[...], w1_ref[...], preferred_element_type=jnp.float32)
    h = jnp.maximum(h + b1_ref[...].astype(jnp.float32), 0.0)
    part = jnp.dot(h.astype(w2_ref.dtype), w2_ref[...],
                   preferred_element_type=jnp.float32)

    @pl.when(k == 0)
    def _():
        acc_ref[...] = part

    @pl.when(k > 0)
    def _():
        acc_ref[...] = acc_ref[...] + part

    @pl.when(k == pl.num_programs(1) - 1)
    def _():
        o_ref[...] = (acc_ref[...] + b2_ref[...].astype(jnp.float32)
                      ).astype(o_ref.dtype)


# --------------------------------------------------------------------------- #
# Wrapper
# --------------------------------------------------------------------------- #
@functools.partial(
    jax.jit, static_argnames=("tm_max", "compute_dtype", "max_vmem_bytes"))
def feed_forward(x, w1, b1, w2, b2, *, tm_max=None, compute_dtype=None,
                 max_vmem_bytes=None):
    """x: (batch, seq, d_model) -> (batch, seq, d_model).

    w1: (d_model, hidden), b1: (hidden,), w2: (hidden, d_model), b2: (d_model,)
    (weights are the transpose of torch.nn.Linear.weight).

    compute_dtype: MXU dtype for x/W1/W2/h (e.g. jnp.bfloat16); accumulation
      is always f32.  max_vmem_bytes: optional override of the tile-selection
      VMEM budget (testing / tuning knob).
    """
    batch, seq, d_model = x.shape
    hidden = w1.shape[1]
    m = batch * seq

    out_dtype = x.dtype
    cd = jnp.dtype(compute_dtype) if compute_dtype is not None else jnp.dtype(x.dtype)
    cb = cd.itemsize
    ob = jnp.dtype(out_dtype).itemsize
    out_is_f32 = jnp.dtype(out_dtype) == jnp.float32
    row_align = 8 if (cb == 4 and ob == 4) else 16  # sublane packing for bf16

    # --- per-chip VMEM budget ------------------------------------------------
    cap = _vmem_capacity_bytes()
    budget = int(cap * 0.78)            # ~100 MiB on 128 MiB parts, ~50 MiB on v7x
    if max_vmem_bytes is not None:
        budget = min(budget, int(max_vmem_bytes))
    budget = max(budget, 1 << 20)

    # --- lane-dense feature padding -------------------------------------------
    d_model_p = _round_up(d_model, 128)
    hidden_p = _round_up(hidden, 128)

    # --- row tiling: balance last tile, keep >=2 tiles for megacore -----------
    if tm_max is None:
        big_vmem = cap >= (96 << 20)
        tm_max = (1024 if big_vmem else 512) if cb == 2 else (512 if big_vmem else 256)
    tm_cap = max(row_align, (int(tm_max) // row_align) * row_align)
    n_guess = max(_cdiv(m, tm_cap), 2 if m >= 2 * row_align else 1)
    tm = _round_up(_cdiv(m, n_guess), row_align)

    # --- schedule: weights-resident fast path vs hidden-axis (k) tiling -------
    weight_bytes = 2 * d_model_p * hidden_p * cb + 2 * 8 * (hidden_p + d_model_p) * 4
    per_row_res = 2 * d_model_p * (cb + ob) + hidden_p * (4 + cb)
    resident = weight_bytes + row_align * per_row_res <= budget
    if resident:
        tm_fit = ((budget - weight_bytes) // per_row_res // row_align) * row_align
        tm = max(row_align, min(tm, tm_fit))
        th, nk = hidden_p, 1
        acc_bytes = 0
    else:
        while True:
            acc_bytes = 0 if out_is_f32 else tm * d_model_p * 4
            fixed = 2 * tm * d_model_p * (cb + ob) + 2 * 8 * d_model_p * 4 + acc_bytes
            per_th = 4 * d_model_p * cb + 64 + tm * (4 + cb)
            th_fit = ((budget - fixed) // per_th // 128) * 128 if budget > fixed else 0
            if th_fit >= 128 or tm <= row_align:
                break
            tm = max(row_align, ((tm // 2) // row_align) * row_align)
        th_fit = min(max(th_fit, 128), hidden_p)
        nk = _cdiv(hidden_p, th_fit)
        th = _round_up(_cdiv(hidden_p, nk), 128)   # balanced hidden tiles
        hidden_p = nk * th

    n_rows = _cdiv(m, tm)
    m_p = n_rows * tm

    # --- pad / cast operands (padding skipped when already aligned) -----------
    # NOTE: for unaligned weights this pad costs an extra HBM pass per call;
    # pre-pad parameters once at model setup to avoid it in a real model.
    x2d = x.reshape(m, d_model)
    if (m_p, d_model_p) != (m, d_model):
        x2d = jnp.pad(x2d, ((0, m_p - m), (0, d_model_p - d_model)))
    x2d = x2d.astype(cd)

    def _prep_w(w, r, c):
        if w.shape != (r, c):
            w = jnp.pad(w, ((0, r - w.shape[0]), (0, c - w.shape[1])))
        return w.astype(cd)

    def _prep_b(b, c):
        if b.shape[0] != c:
            b = jnp.pad(b, (0, c - b.shape[0]))
        return b.astype(jnp.float32).reshape(1, c)

    w1_p = _prep_w(w1, d_model_p, hidden_p)
    w2_p = _prep_w(w2, hidden_p, d_model_p)
    b1_p = _prep_b(b1, hidden_p)
    b2_p = _prep_b(b2, d_model_p)

    # --- VMEM footprint & scoped limit (double-buffered BlockSpec tiles) ------
    footprint = (2 * tm * d_model_p * cb                    # x tiles
                 + 2 * d_model_p * th * cb                  # W1 slice
                 + 2 * th * d_model_p * cb                  # W2 slice
                 + 2 * 8 * th * 4 + 2 * 8 * d_model_p * 4   # biases (sublane-padded)
                 + 2 * tm * d_model_p * ob                  # out tiles
                 + acc_bytes                                # f32 acc (bf16 out only)
                 + tm * th * (4 + cb))                      # hidden intermediate
    vmem_limit = int(max(16 << 20,
                         min(int(cap * 0.92), int(footprint * 1.3) + (4 << 20))))

    # --- cost estimate (weights re-streamed per row tile when k-tiled) --------
    weight_passes = 1 if nk == 1 else n_rows
    cost = pl.CostEstimate(
        flops=4 * m_p * d_model_p * hidden_p,
        transcendentals=0,
        bytes_accessed=int(m_p * d_model_p * (cb + ob)
                           + weight_passes * 2 * d_model_p * hidden_p * cb
                           + (hidden_p + d_model_p) * 4),
    )

    if nk == 1:
        grid = (n_rows,)
        in_specs = [
            pl.BlockSpec((tm, d_model_p), lambda i: (i, 0)),          # x tile
            pl.BlockSpec((d_model_p, hidden_p), lambda i: (0, 0)),    # W1 (resident)
            pl.BlockSpec((1, hidden_p), lambda i: (0, 0)),            # b1
            pl.BlockSpec((hidden_p, d_model_p), lambda i: (0, 0)),    # W2 (resident)
            pl.BlockSpec((1, d_model_p), lambda i: (0, 0)),           # b2
        ]
        out_specs = pl.BlockSpec((tm, d_model_p), lambda i: (i, 0))
        kernel = _ffn_kernel_resident
        scratch_shapes = []
        dim_sem = ("parallel",)
    else:
        grid = (n_rows, nk)
        in_specs = [
            pl.BlockSpec((tm, d_model_p), lambda i, k: (i, 0)),       # x tile
            pl.BlockSpec((d_model_p, th), lambda i, k: (0, k)),       # W1 slice
            pl.BlockSpec((1, th), lambda i, k: (0, k)),               # b1 slice
            pl.BlockSpec((th, d_model_p), lambda i, k: (k, 0)),       # W2 slice
            pl.BlockSpec((1, d_model_p), lambda i, k: (0, 0)),        # b2
        ]
        out_specs = pl.BlockSpec((tm, d_model_p), lambda i, k: (i, 0))
        if out_is_f32:
            kernel = _ffn_kernel_ktiled_f32out
            scratch_shapes = []
        else:
            kernel = _ffn_kernel_ktiled_scratch
            scratch_shapes = [pltpu.VMEM((tm, d_model_p), jnp.float32)]
        dim_sem = ("parallel", "arbitrary")

    out2d = pl.pallas_call(
        kernel,
        out_shape=jax.ShapeDtypeStruct((m_p, d_model_p), out_dtype),
        grid_spec=pltpu.PrefetchScalarGridSpec(
            num_scalar_prefetch=0,
            grid=grid,
            in_specs=in_specs,
            out_specs=out_specs,
            scratch_shapes=scratch_shapes,
        ),
        compiler_params=pltpu.CompilerParams(
            dimension_semantics=dim_sem,
            vmem_limit_bytes=vmem_limit,
        ),
        cost_estimate=cost,
    )(x2d, w1_p, b1_p, w2_p, b2_p)

    return out2d[:m, :d_model].reshape(batch, seq, d_model)


# --------------------------------------------------------------------------- #
# Reference & tests
# --------------------------------------------------------------------------- #
def _ref_feed_forward(x, w1, b1, w2, b2):
    hi = jax.lax.Precision.HIGHEST
    h = jnp.maximum(jnp.dot(x, w1, precision=hi) + b1, 0.0)
    return jnp.dot(h, w2, precision=hi) + b2


def _make_params(key, d_model, hidden):
    kw1, kb1, kw2, kb2 = jax.random.split(key, 4)
    lim1 = 1.0 / (d_model ** 0.5)
    lim2 = 1.0 / (hidden ** 0.5)
    w1 = jax.random.uniform(kw1, (d_model, hidden), jnp.float32, -lim1, lim1)
    b1 = jax.random.uniform(kb1, (hidden,), jnp.float32, -lim1, lim1)
    w2 = jax.random.uniform(kw2, (hidden, d_model), jnp.float32, -lim2, lim2)
    b2 = jax.random.uniform(kb2, (d_model,), jnp.float32, -lim2, lim2)
    return w1, b1, w2, b2


if __name__ == "__main__":
    key = jax.random.PRNGKey(0)

    # Test 1: small shapes consistent with the module; f32, auto budget
    # (weights-resident fast path).
    batch, seq, d_model, hidden = 2, 8, 32, 64
    k1, k2, key = jax.random.split(key, 3)
    x = jax.random.normal(k1, (batch, seq, d_model), dtype=jnp.float32)
    w1, b1, w2, b2 = _make_params(k2, d_model, hidden)

    out = jax.block_until_ready(feed_forward(x, w1, b1, w2, b2))
    ref = _ref_feed_forward(x, w1, b1, w2, b2)
    assert out.shape == (batch, seq, d_model)
    assert jnp.allclose(out, ref, atol=1e-5, rtol=1e-5), "mismatch (resident f32)"

    # Test 2: unaligned dims + forced tiny VMEM budget -> k-tiled path that
    # accumulates the f32 output in place (no scratch), multiple row tiles.
    batch2, seq2, d_model2, hidden2 = 2, 160, 48, 600
    k3, k4 = jax.random.split(key, 2)
    x2 = jax.random.normal(k3, (batch2, seq2, d_model2), dtype=jnp.float32)
    w1b, b1b, w2b, b2b = _make_params(k4, d_model2, hidden2)

    out2 = jax.block_until_ready(
        feed_forward(x2, w1b, b1b, w2b, b2b, max_vmem_bytes=512 * 1024))
    ref2 = _ref_feed_forward(x2, w1b, b1b, w2b, b2b)
    assert out2.shape == (batch2, seq2, d_model2)
    assert jnp.allclose(out2, ref2, atol=1e-4, rtol=1e-4), "mismatch (k-tiled f32)"

    # Test 3: bf16 inputs/weights + tiny budget -> k-tiled path with f32 scratch
    # accumulator and bf16 output.
    x_bf = x2.astype(jnp.bfloat16)
    w1_bf, b1_bf = w1b.astype(jnp.bfloat16), b1b.astype(jnp.bfloat16)
    w2_bf, b2_bf = w2b.astype(jnp.bfloat16), b2b.astype(jnp.bfloat16)
    out3 = jax.block_until_ready(
        feed_forward(x_bf, w1_bf, b1_bf, w2_bf, b2_bf, max_vmem_bytes=256 * 1024))
    ref3 = _ref_feed_forward(x_bf.astype(jnp.float32), w1_bf.astype(jnp.float32),
                             b1_bf.astype(jnp.float32), w2_bf.astype(jnp.float32),
                             b2_bf.astype(jnp.float32))
    assert out3.dtype == jnp.bfloat16
    assert jnp.allclose(out3.astype(jnp.float32), ref3, atol=3e-2, rtol=3e-2), \
        "mismatch (k-tiled bf16)"

    # Test 4: f32 in/out with the bf16 MXU hot path (compute_dtype), auto budget.
    out4 = jax.block_until_ready(
        feed_forward(x2, w1b, b1b, w2b, b2b, compute_dtype=jnp.bfloat16))
    assert out4.dtype == jnp.float32
    assert jnp.allclose(out4, ref2, atol=5e-2, rtol=5e-2), "mismatch (bf16 compute)"

    print("KERNEL_OK")
</pallas_src>

<mosaic_0001>
module attributes {stable_mosaic.version = 11 : i64} {
  func.func @_ffn_kernel_resident(%arg0: i32, %arg1: memref<8x128xf32, #tpu.memory_space<vmem>>, %arg2: memref<128x128xf32, #tpu.memory_space<vmem>>, %arg3: memref<1x128xf32, #tpu.memory_space<vmem>>, %arg4: memref<128x128xf32, #tpu.memory_space<vmem>>, %arg5: memref<1x128xf32, #tpu.memory_space<vmem>>, %arg6: memref<8x128xf32, #tpu.memory_space<vmem>>) attributes {dimension_semantics = [#tpu.dimension_semantics<parallel>], iteration_bounds = array<i64: 2>, scalar_prefetch = 0 : i64, scratch_operands = 0 : i64, tpu.core_type = #tpu.core_type<tc>, window_params = [{transform_indices = @transform_0, window_bounds = array<i64: 8, 128>}, {pipeline_mode = #tpu.pipeline_mode<synchronous>, transform_indices = @transform_1, window_bounds = array<i64: 128, 128>}, {pipeline_mode = #tpu.pipeline_mode<synchronous>, transform_indices = @transform_2, window_bounds = array<i64: 1, 128>}, {pipeline_mode = #tpu.pipeline_mode<synchronous>, transform_indices = @transform_3, window_bounds = array<i64: 128, 128>}, {pipeline_mode = #tpu.pipeline_mode<synchronous>, transform_indices = @transform_4, window_bounds = array<i64: 1, 128>}, {transform_indices = @transform_5, window_bounds = array<i64: 8, 128>}]} {
    %c0 = arith.constant 0 : index
    %c0_0 = arith.constant 0 : index
    %0 = vector.load %arg1[%c0, %c0_0] : memref<8x128xf32, #tpu.memory_space<vmem>>, vector<8x128xf32>
    %c0_1 = arith.constant 0 : index
    %c0_2 = arith.constant 0 : index
    %1 = vector.load %arg2[%c0_1, %c0_2] : memref<128x128xf32, #tpu.memory_space<vmem>>, vector<128x128xf32>
    %cst = arith.constant dense<0.000000e+00> : vector<8x128xf32>
    %2 = tpu.matmul %0, %1, %cst {dimension_numbers = #tpu.dot_dimension_numbers<[1], [0], [0], [1], [0, 0, 1, 1], [], []>} : vector<8x128xf32>, vector<128x128xf32>, vector<8x128xf32> -> vector<8x128xf32>
    %c0_3 = arith.constant 0 : index
    %c0_4 = arith.constant 0 : index
    %3 = vector.load %arg3[%c0_3, %c0_4] : memref<1x128xf32, #tpu.memory_space<vmem>>, vector<1x128xf32>
    %4 = vector.broadcast %3 : vector<1x128xf32> to vector<8x128xf32>
    %5 = arith.addf %2, %4 : vector<8x128xf32>
    %cst_5 = arith.constant 0.000000e+00 : f32
    %6 = vector.broadcast %cst_5 : f32 to vector<8x128xf32>
    %7 = arith.maximumf %5, %6 : vector<8x128xf32>
    %c0_6 = arith.constant 0 : index
    %c0_7 = arith.constant 0 : index
    %8 = vector.load %arg4[%c0_6, %c0_7] : memref<128x128xf32, #tpu.memory_space<vmem>>, vector<128x128xf32>
    %cst_8 = arith.constant dense<0.000000e+00> : vector<8x128xf32>
    %9 = tpu.matmul %7, %8, %cst_8 {dimension_numbers = #tpu.dot_dimension_numbers<[1], [0], [0], [1], [0, 0, 1, 1], [], []>} : vector<8x128xf32>, vector<128x128xf32>, vector<8x128xf32> -> vector<8x128xf32>
    %c0_9 = arith.constant 0 : index
    %c0_10 = arith.constant 0 : index
    %10 = vector.load %arg5[%c0_9, %c0_10] : memref<1x128xf32, #tpu.memory_space<vmem>>, vector<1x128xf32>
    %11 = vector.broadcast %10 : vector<1x128xf32> to vector<8x128xf32>
    %12 = arith.addf %9, %11 : vector<8x128xf32>
    %c0_11 = arith.constant 0 : index
    %c0_12 = arith.constant 0 : index
    %13 = vector.load %arg6[%c0_11, %c0_12] : memref<8x128xf32, #tpu.memory_space<vmem>>, vector<8x128xf32>
    tpu.vector_store %arg6[%c0_11, %c0_12], %12 {strides = array<i32>} : memref<8x128xf32, #tpu.memory_space<vmem>>, vector<8x128xf32>,
    return
  }
  func.func @transform_0(%arg0: i32) -> (i32, i32) {
    %c0_i32 = arith.constant 0 : i32
    %c0_i32_0 = arith.constant 0 : i32
    return %arg0, %c0_i32 : i32, i32
  }
  func.func @transform_1(%arg0: i32) -> (i32, i32) {
    %c0_i32 = arith.constant 0 : i32
    %c0_i32_0 = arith.constant 0 : i32
    %c0_i32_1 = arith.constant 0 : i32
    return %c0_i32, %c0_i32_0 : i32, i32
  }
  func.func @transform_2(%arg0: i32) -> (i32, i32) {
    %c0_i32 = arith.constant 0 : i32
    %c0_i32_0 = arith.constant 0 : i32
    %c0_i32_1 = arith.constant 0 : i32
    return %c0_i32, %c0_i32_0 : i32, i32
  }
  func.func @transform_3(%arg0: i32) -> (i32, i32) {
    %c0_i32 = arith.constant 0 : i32
    %c0_i32_0 = arith.constant 0 : i32
    %c0_i32_1 = arith.constant 0 : i32
    return %c0_i32, %c0_i32_0 : i32, i32
  }
  func.func @transform_4(%arg0: i32) -> (i32, i32) {
    %c0_i32 = arith.constant 0 : i32
    %c0_i32_0 = arith.constant 0 : i32
    %c0_i32_1 = arith.constant 0 : i32
    return %c0_i32, %c0_i32_0 : i32, i32
  }
  func.func @transform_5(%arg0: i32) -> (i32, i32) {
    %c0_i32 = arith.constant 0 : i32
    %c0_i32_0 = arith.constant 0 : i32
    return %arg0, %c0_i32 : i32, i32
  }
}

</mosaic_0001>

<bundles_post_ra>
// kernel: feed_forward.1
= control target key start
LH: loop header
LB: loop body
LE: loop exit
PB: predicated region body
PF: predicated region fallthrough
CT: control target
= control target key end

     0   :  { %s677_s18 = smov 0   ;;  %s819_s0 = inlined_call_operand.vmem [shape: f32[16,128], index: 0, kind: input, shape index: {}]   ;;  %s820_s1 = inlined_call_operand.vmem [shape: f32[128,128], index: 1, kind: input, shape index: {}]   ;;  %s821_s2 = inlined_call_operand.vmem [shape: f32[1,128], index: 2, kind: input, shape index: {}]   ;;  %s822_s3 = inlined_call_operand.vmem [shape: f32[128,128], index: 3, kind: input, shape index: {}]   ;;  %s823_s4 = inlined_call_operand.vmem [shape: f32[1,128], index: 4, kind: input, shape index: {}]   ;;  %s824_s5 = inlined_call_operand.vmem [shape: f32[16,128], index: 5, kind: output, shape index: {}]  }
   0x1 LB: > { %s462_s19 = sadd.s32 4294967295, %s642_s18   ;;  %p466_p0 = scmp.ge.s32.totalorder %s642_s18, 1  ;;  %s642_s18 = sphi %s677_s18, %s15_s18  }
   0x2   : > { %p186_p1 = scmp.lt.s32.totalorder %s642_s18, 3 }
   0x4   : > { %p187_p2 = pnand %p466_p0, %p186_p1 }
   0x5   : > { %v221_v0 = vld [vmem:[%s820_s1] sm:$0xff] (!%p187_p2)  ;;  %v222_v1 = vld [vmem:[%s820_s1 + $0x8] sm:$0xff] (!%p187_p2)  ;;  %v223_v2 = vld [vmem:[%s820_s1 + $0x10] sm:$0xff] (!%p187_p2)  ;;  %v644_v3 = vmov (!%p187_p2), 0.0|0.0   ;;  %vm645_vm0 = vmmov (!%p187_p2), 0   ;;  %v646_v6 = vmov (!%p187_p2), 0.0  }
   0x6   : > { %190 = sbr.rel (%p187_p2) target bundleno = 470 (0x1d6), region = 40  ;;  %577 = vmatprep.subr.bf16.mxu0 (!%p187_p2), %v644_v3  ;;  %v578_v4 = vpack.c.bf16 (!%p187_p2), %v222_v1, %v221_v0  ;;  %v224_v5 = vld [vmem:[%s820_s1 + $0x18] sm:$0xff] (!%p187_p2)  ;;  %539 = vmatprep.mubr.msk.f32.mxu0 (!%p187_p2), %vm645_vm0, %v646_v6  ;;  %v225_v8 = vld [vmem:[%s820_s1 + $0x20] sm:$0xff] (!%p187_p2)  ;;  %v226_v9 = vld [vmem:[%s820_s1 + $0x28] sm:$0xff] (!%p187_p2)  ;;  %p212_p3 = scmp.lt.s32.totalorder (!%p187_p2), %s462_s19, 1 }
   0x7   : > { %601 = vmatprep.subr.bf16.mxu1 (!%p187_p2), %v644_v3  ;;  %574 = vmatprep.mubr.msk.f32.mxu1 (!%p187_p2), %vm645_vm0, %v646_v6  ;;  %v581_v7 = vpack.c.bf16 (!%p187_p2), %v224_v5, %v223_v2  ;;  %v315_v10 = vld [vmem:[%s822_s3] sm:$0xff] (!%p187_p2)  ;;  %v316_v11 = vld [vmem:[%s822_s3 + $0x8] sm:$0xff] (!%p187_p2)  ;;  %v317_v13 = vld [vmem:[%s822_s3 + $0x10] sm:$0xff] (!%p187_p2)  ;;  %v584_v15 = vpack.c.bf16 (!%p187_p2), %v226_v9, %v225_v8 }
   0x8   : > { %579 = vmatpush3.bf16.msra.mxu0 (!%p187_p2), %v578_v4  ;;  %v602_v12 = vpack.c.bf16 (!%p187_p2), %v316_v11, %v315_v10  ;;  %v318_v14 = vld [vmem:[%s822_s3 + $0x18] sm:$0xff] (!%p187_p2)  ;;  %v227_v16 = vld [vmem:[%s820_s1 + $0x30] sm:$0xff] (!%p187_p2)  ;;  %v319_v19 = vld [vmem:[%s822_s3 + $0x20] sm:$0xff] (!%p187_p2) }
   0x9   : > { %580 = vmatprep.subr.bf16.mxu0 (!%p187_p2), %v644_v3  ;;  %v228_v17 = vld [vmem:[%s820_s1 + $0x38] sm:$0xff] (!%p187_p2)  ;;  %v605_v18 = vpack.c.bf16 (!%p187_p2), %v318_v14, %v317_v13  ;;  %v320_v20 = vld [vmem:[%s822_s3 + $0x28] sm:$0xff] (!%p187_p2)  ;;  %v229_v22 = vld [vmem:[%s820_s1 + $0x40] sm:$0xff] (!%p187_p2) }
   0xa   : > { %603 = vmatpush3.bf16.msra.mxu1 (!%p187_p2), %v602_v12  ;;  %v587_v21 = vpack.c.bf16 (!%p187_p2), %v228_v17, %v227_v16  ;;  %v230_v23 = vld [vmem:[%s820_s1 + $0x48] sm:$0xff] (!%p187_p2)  ;;  %v608_v24 = vpack.c.bf16 (!%p187_p2), %v320_v20, %v319_v19  ;;  %v321_v25 = vld [vmem:[%s822_s3 + $0x30] sm:$0xff] (!%p187_p2)  ;;  %v322_v26 = vld [vmem:[%s822_s3 + $0x38] sm:$0xff] (!%p187_p2) }
   0xb   : > { %604 = vmatprep.subr.bf16.mxu1 (!%p187_p2), %v644_v3  ;;  %v590_v27 = vpack.c.bf16 (!%p187_p2), %v230_v23, %v229_v22  ;;  %v231_v28 = vld [vmem:[%s820_s1 + $0x50] sm:$0xff] (!%p187_p2)  ;;  %v232_v29 = vld [vmem:[%s820_s1 + $0x58] sm:$0xff] (!%p187_p2)  ;;  %v611_v30 = vpack.c.bf16 (!%p187_p2), %v322_v26, %v321_v25  ;;  %v323_v31 = vld [vmem:[%s822_s3 + $0x40] sm:$0xff] (!%p187_p2) }
   0xc   : > { %582 = vmatpush3.bf16.msra.mxu0 (!%p187_p2), %v581_v7  ;;  %v324_v32 = vld [vmem:[%s822_s3 + $0x48] sm:$0xff] (!%p187_p2)  ;;  %v593_v33 = vpack.c.bf16 (!%p187_p2), %v232_v29, %v231_v28  ;;  %v233_v34 = vld [vmem:[%s820_s1 + $0x60] sm:$0xff] (!%p187_p2)  ;;  %v325_v37 = vld [vmem:[%s822_s3 + $0x50] sm:$0xff] (!%p187_p2) }
   0xd   : > { %583 = vmatprep.subr.bf16.mxu0 %v644_v3  ;;  %v234_v35 = vld [vmem:[%s820_s1 + $0x68] sm:$0xff]  ;;  %v614_v36 = vpack.c.bf16 %v324_v32, %v323_v31  ;;  %s826_s19 = smov (!%p212_p3, %s462_s19), 1  ;;  %v326_v38 = vld [vmem:[%s822_s3 + $0x58] sm:$0xff]  ;;  %v235_v40 = vld [vmem:[%s820_s1 + $0x70] sm:$0xff] }
   0xe   : > { %606 = vmatpush3.bf16.msra.mxu1 %v605_v18  ;;  %v596_v39 = vpack.c.bf16 %v234_v35, %v233_v34  ;;  %v236_v41 = vld [vmem:[%s820_s1 + $0x78] sm:$0xff]  ;;  %v617_v42 = vpack.c.bf16 %v326_v38, %v325_v37  ;;  %s467_s30 = sshll.u32 %s826_s19, 3  ;;  %v327_v43 = vld [vmem:[%s822_s3 + $0x60] sm:$0xff]  ;;  %v328_v44 = vld [vmem:[%s822_s3 + $0x68] sm:$0xff] }
   0xf   : > { %607 = vmatprep.subr.bf16.mxu1 %v644_v3  ;;  %v599_v45 = vpack.c.bf16 %v236_v41, %v235_v40  ;;  %s215_s12 = scalar_lea.vmem %s819_s0, %s467_s30  ;;  %v620_v46 = vpack.c.bf16 %v328_v44, %v327_v43  ;;  %v329_v48 = vld [vmem:[%s822_s3 + $0x70] sm:$0xff]  ;;  %v330_v49 = vld [vmem:[%s822_s3 + $0x78] sm:$0xff]  ;;  %v469_v51 = vld [vmem:[%s821_s2] ss:$0 sm:$0xff]  ;;  %s219_s24 = scalar_lea.vmem %s824_s5, %s467_s30 }
  0x10   : > { %585 = vmatpush3.bf16.msra.mxu0 %v584_v15  ;;  %v220_v47 = vld [vmem:[%s215_s12] sm:$0xff]  ;;  %v623_v50 = vpack.c.bf16 %v330_v49, %v329_v48 }
  0x11   : > { %586 = vmatprep.subr.bf16.mxu0 %v644_v3  ;;  %v470_v56 = vld [vmem:[%s823_s4] ss:$0 sm:$0xff] }
  0x12   : > { %609 = vmatpush3.bf16.msra.mxu1 %v608_v24 }
  0x13   : > { %610 = vmatprep.subr.bf16.mxu1 %v644_v3 }
  0x14   : > { %588 = vmatpush3.bf16.msra.mxu0 %v587_v21 }
  0x15   : > { %589 = vmatprep.subr.bf16.mxu0 %v644_v3 }
  0x16   : > { %612 = vmatpush3.bf16.msra.mxu1 %v611_v30 }
  0x17   : > { %613 = vmatprep.subr.bf16.mxu1 %v644_v3 }
  0x18   : > { %591 = vmatpush3.bf16.msra.mxu0 %v590_v27 }
  0x19   : > { %592 = vmatprep.subr.bf16.mxu0 %v644_v3 }
  0x1a   : > { %615 = vmatpush3.bf16.msra.mxu1 %v614_v36 }
  0x1b   : > { %616 = vmatprep.subr.bf16.mxu1 %v644_v3 }
  0x1c   : > { %594 = vmatpush3.bf16.msra.mxu0 %v593_v33 }
  0x1d   : > { %595 = vmatprep.subr.bf16.mxu0 %v644_v3 }
  0x1e   : > { %618 = vmatpush3.bf16.msra.mxu1 %v617_v42 }
  0x1f   : > { %619 = vmatprep.subr.bf16.mxu1 %v644_v3 }
  0x20   : > { %597 = vmatpush3.bf16.msra.mxu0 %v596_v39 }
  0x21   : > { %598 = vmatprep.subr.bf16.mxu0 %v644_v3 }
  0x22   : > { %621 = vmatpush3.bf16.msra.mxu1 %v620_v46 }
  0x23   : > { %622 = vmatprep.subr.bf16.mxu1 %v644_v3 }
  0x24   : > { %600 = vmatpush3.bf16.msra.mxu0 %v599_v45 }
  0x26   : > { %624 = vmatpush3.bf16.msra.mxu1 %v623_v50 }
  0x27   : > { %540 = vmatmul.mubr.f32.vlgmr.msra.gmra.mrb[0].mxu0 %v220_v47 }
  0xfa   : > { %v310_v52 = vpop.f32.mrb[0].mxu0 }
  0xfb   : > { %v311_v53 = vadd.f32 %v469_v51, %v310_v52  ;;  %v541_v54 = vpop.f32.mrb[1].mxu0 }
  0xfd   : > { %v314_v55 = vmax.f32 %v311_v53, 0.0 }
  0xff   : > { %575 = vmatmul.mubr.f32.vlgmr.msra.gmra.mrb[0].mxu1 %v314_v55 }
 0x1d2   : > { %v404_v57 = vpop.f32.mrb[0].mxu1 }
 0x1d3   : > { %v405_v58 = vadd.f32 %v470_v56, %v404_v57  ;;  %v576_v59 = vpop.f32.mrb[1].mxu1 }
 0x1d5   : > { %408 = vst [vmem:[%s219_s24] sm:$0xff] %v405_v58 }
 0x1d6 PF: > { %s15_s18 = sadd.s32 1, %s642_s18  }
 0x1d7   : > { %p12_p4 = scmp.ge.s32.totalorder %s15_s18, 4  }
 0x1d9   :  { %14 = sbr.rel (!%p12_p4) target bundleno = 1 (0x1), region = 70 }

</bundles_post_ra>
